<compile_context>
chip_gen: v6e
topology: v6e:2x2x1
jax: 0.10.0
libtpu: 0.0.40
codegen_flags: <defaults>
</compile_context>

<pallas_src>
import functools

import numpy as np

import jax
import jax.numpy as jnp
from jax.experimental import pallas as pl
from jax.experimental.pallas import tpu as pltpu


_BLOCK_VMEM_BUDGET_BYTES = 24 * 1024 * 1024   # blocks + temporaries target
_VMEM_LIMIT_BYTES = 48 * 1024 * 1024          # safe on v5e/v6e (128 MiB) and v7x (64 MiB/TC)
_MIN_GRID_STEPS = 8                           # >=2 steps per TC on v7x + pipeline overlap


def _extreme_pool_kernel(x_ref, sel_ref, mask_ref, o_ref, *, kd, kh, kw, W, flat_dot):
    # x_ref:    (TN, kd, THo, kh*W)   -- Do squeezed away by the BlockSpec
    # sel_ref:  (kh*W, Wo)            -- 0/1 selection matrix (anchor lane -> column)
    # mask_ref: (1, kh*W)             -- 1.0 at anchor lanes wo*kw, else 0.0
    # o_ref:    (TN, THo, Wo)
    TN, _, THo, khW = x_ref.shape
    anchor = mask_ref[...] > 0.5                       # (1, kh*W), broadcasts

    dbest = None
    dabs = None
    for dz in range(kd):                               # static unroll (kd small)
        plane = x_ref[:, dz]                           # (TN, THo, kh*W) dense slice

        # --- w stage (innermost window axis): reduced first so ties keep the
        #     smallest w -------------------------------------------------------
        vbest = plane
        vabs = jnp.abs(plane)
        for wx in range(1, kw):
            cand = pltpu.roll(plane, khW - wx, axis=2)       # cand[l] = plane[l + wx]
            cabs = jnp.abs(cand)
            take = cabs > vabs                               # strict '>': first occurrence wins
            vbest = jnp.where(take, cand, vbest)
            vabs = jnp.maximum(vabs, cabs)

        # --- h stage: rows live on the lane axis at stride W -------------------
        hbest = vbest
        habs = vabs
        for hy in range(1, kh):
            cand = pltpu.roll(vbest, khW - hy * W, axis=2)   # cand[l] = vbest[l + hy*W]
            cabs = jnp.abs(cand)
            take = cabs > habs
            hbest = jnp.where(take, cand, hbest)
            habs = jnp.maximum(habs, cabs)

        # --- d stage: outermost merge across kd dense planes -------------------
        if dbest is None:
            dbest, dabs = hbest, habs
        else:
            take = habs > dabs
            dbest = jnp.where(take, hbest, dbest)
            dabs = jnp.maximum(dabs, habs)

    # Compact anchor lanes (wo*kw) into a dense Wo axis with an exact 0/1
    # selection matmul on the MXU.  Zero garbage lanes first (inf-safety).
    masked = jnp.where(anchor, dbest, jnp.zeros_like(dbest))
    sel = sel_ref[...]                                  # (kh*W, Wo)
    if flat_dot:
        Wo = sel.shape[1]
        flat = masked.reshape(TN * THo, khW)            # free: THo is sublane-aligned
        out = jnp.dot(flat, sel, preferred_element_type=jnp.float32)
        o_ref[...] = out.reshape(TN, THo, Wo).astype(o_ref.dtype)
    else:
        # TODO(synk): slow path for sublane-unaligned THo (tiny problems only).
        for n in range(TN):
            out_n = jnp.dot(masked[n], sel, preferred_element_type=jnp.float32)
            o_ref[n] = out_n.astype(o_ref.dtype)


def _footprint_bytes(tn, tho, khW, kd, wo, itemsize):
    in_blk = tn * kd * tho * khW * itemsize       # input block
    out_blk = tn * tho * wo * itemsize            # output block
    temps = 8 * tn * tho * khW * itemsize         # live best/abs/cand temporaries
    return 2 * (in_blk + out_blk) + temps         # x2: double-buffered pipeline


def _choose_tiles(N, Do, Ho, Wo, khW, kd, itemsize, sublane):
    """Pick (TN, THo): biggest blocks that fit the VMEM budget while keeping at
    least _MIN_GRID_STEPS grid steps (v7x 2-TC sharding + pipeline overlap)."""
    tho_cands = [t for t in range(Ho, 0, -1)
                 if Ho % t == 0 and (t == Ho or t % sublane == 0)]
    tn_cands = [t for t in range(N, 0, -1) if N % t == 0]
    best_key, best = None, None
    for tho in tho_cands:
        for tn in tn_cands:
            if _footprint_bytes(tn, tho, khW, kd, Wo, itemsize) > _BLOCK_VMEM_BUDGET_BYTES:
                continue
            steps = (N // tn) * Do * (Ho // tho)
            key = (steps >= _MIN_GRID_STEPS, tn * tho)
            if best_key is None or key > best_key:
                best_key, best = key, (tn, tho)
    if best is None:
        # TODO(synk): also tile the lane (kh*W) axis when even the minimal block
        # overflows the budget (only plausible for extremely large W).
        best = (1, tho_cands[-1])
    return best


def extreme_pool3d(x, kernel_size, stride=None, padding=0, dilation=1,
                   ceil_mode=False):
    """x: (B, C, D, H, W) -> (B, C, D//kd, H//kh, W//kw)."""
    if isinstance(kernel_size, int):
        kd = kh = kw = kernel_size
    else:
        kd, kh, kw = kernel_size
    if stride is not None:
        s = (stride,) * 3 if isinstance(stride, int) else tuple(stride)
        if s != (kd, kh, kw):
            raise NotImplementedError("only stride == kernel_size supported")
    if padding != 0 or dilation != 1 or ceil_mode:
        raise NotImplementedError("padding/dilation/ceil_mode not supported")

    B, C, D, H, W = x.shape
    if D % kd or H % kh or W % kw:
        raise NotImplementedError("spatial dims must be divisible by kernel_size")
    Do, Ho, Wo = D // kd, H // kh, W // kw
    N = B * C
    khW = kh * W
    itemsize = jnp.dtype(x.dtype).itemsize
    sublane = max(8, 32 // itemsize)              # 8 f32 / 16 bf16 / 32 int8-fp8

    # Layout-preserving (free) reshape: no transpose / HBM relayout on input.
    x5 = x.reshape(N, Do, kd, Ho, khW)

    TN, THo = _choose_tiles(N, Do, Ho, Wo, khW, kd, itemsize, sublane)
    flat_dot = (THo % sublane == 0)

    # 0/1 selection matrix (anchor lane wo*kw -> output column wo) and mask.
    sel_np = np.zeros((khW, Wo), dtype=np.float32)
    sel_np[np.arange(Wo) * kw, np.arange(Wo)] = 1.0
    mask_np = np.zeros((1, khW), dtype=np.float32)
    mask_np[0, np.arange(Wo) * kw] = 1.0
    sel = jnp.asarray(sel_np, dtype=x.dtype)
    mask = jnp.asarray(mask_np)

    in_elems = N * Do * kd * Ho * khW
    out_elems = N * Do * Ho * Wo
    cost = pl.CostEstimate(
        flops=4 * kh * kw * in_elems + 2 * khW * out_elems,
        transcendentals=0,
        bytes_accessed=(in_elems + out_elems) * itemsize,
    )

    kernel = functools.partial(_extreme_pool_kernel, kd=kd, kh=kh, kw=kw, W=W,
                               flat_dot=flat_dot)

    out = pl.pallas_call(
        kernel,
        out_shape=jax.ShapeDtypeStruct((N, Do, Ho, Wo), x.dtype),
        grid=(N // TN, Do, Ho // THo),
        in_specs=[
            pl.BlockSpec((TN, None, kd, THo, khW), lambda n, d, h: (n, d, 0, h, 0)),
            pl.BlockSpec((khW, Wo), lambda n, d, h: (0, 0)),
            pl.BlockSpec((1, khW), lambda n, d, h: (0, 0)),
        ],
        out_specs=pl.BlockSpec((TN, None, THo, Wo), lambda n, d, h: (n, d, h, 0)),
        compiler_params=pltpu.CompilerParams(
            dimension_semantics=("parallel", "parallel", "parallel"),
            vmem_limit_bytes=_VMEM_LIMIT_BYTES,
        ),
        cost_estimate=cost,
    )(x5, sel, mask)

    # (N, Do, Ho, Wo) -> (B, C, Do, Ho, Wo): free reshape, no output transpose.
    return out.reshape(B, C, Do, Ho, Wo)


def _reference_extreme_pool3d(x, k):
    """Pure-JAX reference (same first-occurrence tie-breaking)."""
    B, C, D, H, W = x.shape
    Do, Ho, Wo = D // k, H // k, W // k
    xw = x.reshape(B, C, Do, k, Ho, k, Wo, k)
    xw = jnp.transpose(xw, (0, 1, 2, 4, 6, 3, 5, 7))   # (B,C,Do,Ho,Wo,k,k,k)
    xw = xw.reshape(B, C, Do, Ho, Wo, k * k * k)
    idx = jnp.argmax(jnp.abs(xw), axis=-1)              # first occurrence on ties
    return jnp.take_along_axis(xw, idx[..., None], axis=-1)[..., 0]


if __name__ == "__main__":
    key = jax.random.PRNGKey(0)
    B, C, D, H, W = 2, 4, 16, 16, 64
    kernel_size = 2
    x = jax.random.normal(key, (B, C, D, H, W), dtype=jnp.float32)

    y = extreme_pool3d(x, kernel_size)
    y = jax.block_until_ready(y)

    y_ref = _reference_extreme_pool3d(x, kernel_size)
    assert y.shape == (B, C, D // 2, H // 2, W // 2), y.shape
    assert jnp.allclose(y, y_ref), "mismatch vs reference"
    print("KERNEL_OK")
</pallas_src>

<mosaic_0001>
module attributes {stable_mosaic.version = 11 : i64} {
  func.func @_extreme_pool_kernel(%arg0: i32, %arg1: i32, %arg2: i32, %arg3: memref<8x1x2x8x128xf32, #tpu.memory_space<vmem>>, %arg4: memref<128x32xf32, #tpu.memory_space<vmem>>, %arg5: memref<1x128xf32, #tpu.memory_space<vmem>>, %arg6: memref<8x1x8x32xf32, #tpu.memory_space<vmem>>) attributes {dimension_semantics = [#tpu.dimension_semantics<parallel>, #tpu.dimension_semantics<parallel>, #tpu.dimension_semantics<parallel>], iteration_bounds = array<i64: 1, 8, 1>, scalar_prefetch = 0 : i64, scratch_operands = 0 : i64, tpu.core_type = #tpu.core_type<tc>, window_params = [{transform_indices = @transform_0, window_bounds = array<i64: 8, 1, 2, 8, 128>}, {pipeline_mode = #tpu.pipeline_mode<synchronous>, transform_indices = @transform_1, window_bounds = array<i64: 128, 32>}, {pipeline_mode = #tpu.pipeline_mode<synchronous>, transform_indices = @transform_2, window_bounds = array<i64: 1, 128>}, {transform_indices = @transform_3, window_bounds = array<i64: 8, 1, 8, 32>}]} {
    %c0 = arith.constant 0 : index
    %c0_0 = arith.constant 0 : index
    %0 = vector.load %arg5[%c0, %c0_0] : memref<1x128xf32, #tpu.memory_space<vmem>>, vector<1x128xf32>
    %cst = arith.constant 5.000000e-01 : f32
    %1 = vector.broadcast %cst : f32 to vector<1x128xf32>
    %2 = arith.cmpf ogt, %0, %1 : vector<1x128xf32>
    %c0_1 = arith.constant 0 : index
    %c0_2 = arith.constant 0 : index
    %c0_3 = arith.constant 0 : index
    %c0_4 = arith.constant 0 : index
    %c0_5 = arith.constant 0 : index
    %3 = vector.load %arg3[%c0_1, %c0_2, %c0_3, %c0_4, %c0_5] : memref<8x1x2x8x128xf32, #tpu.memory_space<vmem>>, vector<8x1x1x8x128xf32>
    %4 = vector.shape_cast %3 : vector<8x1x1x8x128xf32> to vector<8x8x128xf32>
    %5 = math.absf %4 : vector<8x8x128xf32>
    %c127_i32 = arith.constant 127 : i32
    %6 = tpu.dynamic_rotate %4 by %c127_i32 dim 2 : vector<8x8x128xf32>, i32 -> vector<8x8x128xf32>
    %7 = math.absf %6 : vector<8x8x128xf32>
    %8 = arith.cmpf ogt, %7, %5 : vector<8x8x128xf32>
    %9 = arith.select %8, %6, %4 : vector<8x8x128xi1>, vector<8x8x128xf32>
    %10 = arith.maximumf %5, %7 : vector<8x8x128xf32>
    %c64_i32 = arith.constant 64 : i32
    %11 = tpu.dynamic_rotate %9 by %c64_i32 dim 2 : vector<8x8x128xf32>, i32 -> vector<8x8x128xf32>
    %12 = math.absf %11 : vector<8x8x128xf32>
    %13 = arith.cmpf ogt, %12, %10 : vector<8x8x128xf32>
    %14 = arith.select %13, %11, %9 : vector<8x8x128xi1>, vector<8x8x128xf32>
    %15 = arith.maximumf %10, %12 : vector<8x8x128xf32>
    %c0_6 = arith.constant 0 : index
    %c0_7 = arith.constant 0 : index
    %c1 = arith.constant 1 : index
    %c0_8 = arith.constant 0 : index
    %c0_9 = arith.constant 0 : index
    %16 = vector.load %arg3[%c0_6, %c0_7, %c1, %c0_8, %c0_9] : memref<8x1x2x8x128xf32, #tpu.memory_space<vmem>>, vector<8x1x1x8x128xf32>
    %17 = vector.shape_cast %16 : vector<8x1x1x8x128xf32> to vector<8x8x128xf32>
    %18 = math.absf %17 : vector<8x8x128xf32>
    %c127_i32_10 = arith.constant 127 : i32
    %19 = tpu.dynamic_rotate %17 by %c127_i32_10 dim 2 : vector<8x8x128xf32>, i32 -> vector<8x8x128xf32>
    %20 = math.absf %19 : vector<8x8x128xf32>
    %21 = arith.cmpf ogt, %20, %18 : vector<8x8x128xf32>
    %22 = arith.select %21, %19, %17 : vector<8x8x128xi1>, vector<8x8x128xf32>
    %23 = arith.maximumf %18, %20 : vector<8x8x128xf32>
    %c64_i32_11 = arith.constant 64 : i32
    %24 = tpu.dynamic_rotate %22 by %c64_i32_11 dim 2 : vector<8x8x128xf32>, i32 -> vector<8x8x128xf32>
    %25 = math.absf %24 : vector<8x8x128xf32>
    %26 = arith.cmpf ogt, %25, %23 : vector<8x8x128xf32>
    %27 = arith.select %26, %24, %22 : vector<8x8x128xi1>, vector<8x8x128xf32>
    %28 = arith.maximumf %23, %25 : vector<8x8x128xf32>
    %29 = arith.cmpf ogt, %28, %15 : vector<8x8x128xf32>
    %30 = arith.select %29, %27, %14 : vector<8x8x128xi1>, vector<8x8x128xf32>
    %cst_12 = arith.constant 0.000000e+00 : f32
    %31 = vector.broadcast %cst_12 : f32 to vector<8x8x128xf32>
    %32 = vector.shape_cast %2 : vector<1x128xi1> to vector<1x1x128xi1>
    %33 = vector.broadcast %32 : vector<1x1x128xi1> to vector<8x8x128xi1>
    %34 = arith.select %33, %30, %31 : vector<8x8x128xi1>, vector<8x8x128xf32>
    %c0_13 = arith.constant 0 : index
    %c0_14 = arith.constant 0 : index
    %35 = vector.load %arg4[%c0_13, %c0_14] : memref<128x32xf32, #tpu.memory_space<vmem>>, vector<128x32xf32>
    %36 = vector.shape_cast %34 : vector<8x8x128xf32> to vector<64x128xf32>
    %cst_15 = arith.constant dense<0.000000e+00> : vector<64x32xf32>
    %37 = tpu.matmul %36, %35, %cst_15 {dimension_numbers = #tpu.dot_dimension_numbers<[1], [0], [0], [1], [0, 0, 1, 1], [], []>} : vector<64x128xf32>, vector<128x32xf32>, vector<64x32xf32> -> vector<64x32xf32>
    %38 = vector.shape_cast %37 : vector<64x32xf32> to vector<8x8x32xf32>
    %c0_16 = arith.constant 0 : index
    %c0_17 = arith.constant 0 : index
    %c0_18 = arith.constant 0 : index
    %c0_19 = arith.constant 0 : index
    %39 = vector.load %arg6[%c0_16, %c0_17, %c0_18, %c0_19] : memref<8x1x8x32xf32, #tpu.memory_space<vmem>>, vector<8x1x8x32xf32>
    %40 = vector.shape_cast %39 : vector<8x1x8x32xf32> to vector<8x8x32xf32>
    %41 = vector.shape_cast %38 : vector<8x8x32xf32> to vector<8x1x8x32xf32>
    tpu.vector_store %arg6[%c0_16, %c0_17, %c0_18, %c0_19], %41 {strides = array<i32>} : memref<8x1x8x32xf32, #tpu.memory_space<vmem>>, vector<8x1x8x32xf32>,
    return
  }
  func.func @transform_0(%arg0: i32, %arg1: i32, %arg2: i32) -> (i32, i32, i32, i32, i32) {
    %c0_i32 = arith.constant 0 : i32
    %c0_i32_0 = arith.constant 0 : i32
    %c0_i32_1 = arith.constant 0 : i32
    return %arg0, %arg1, %c0_i32, %arg2, %c0_i32_0 : i32, i32, i32, i32, i32
  }
  func.func @transform_1(%arg0: i32, %arg1: i32, %arg2: i32) -> (i32, i32) {
    %c0_i32 = arith.constant 0 : i32
    %c0_i32_0 = arith.constant 0 : i32
    %c0_i32_1 = arith.constant 0 : i32
    return %c0_i32, %c0_i32_0 : i32, i32
  }
  func.func @transform_2(%arg0: i32, %arg1: i32, %arg2: i32) -> (i32, i32) {
    %c0_i32 = arith.constant 0 : i32
    %c0_i32_0 = arith.constant 0 : i32
    %c0_i32_1 = arith.constant 0 : i32
    return %c0_i32, %c0_i32_0 : i32, i32
  }
  func.func @transform_3(%arg0: i32, %arg1: i32, %arg2: i32) -> (i32, i32, i32, i32) {
    %c0_i32 = arith.constant 0 : i32
    %c0_i32_0 = arith.constant 0 : i32
    return %arg0, %arg1, %arg2, %c0_i32 : i32, i32, i32, i32
  }
}

</mosaic_0001>

<bundles_post_ra>
// kernel: tpu_custom_call.1
= control target key start
LH: loop header
LB: loop body
LE: loop exit
PB: predicated region body
PF: predicated region fallthrough
CT: control target
= control target key end

     0   :  { %8 = vsyncpa [#allocation3], 0  ;;  %s1587_s0 = inlined_call_operand.hbm [shape: f32[8,8,2,8,128], index: 0, kind: input, shape index: {}]   ;;  %s1588_s1 = inlined_call_operand.vmem [shape: f32[128,32], index: 1, kind: input, shape index: {}]   ;;  %s1589_s2 = inlined_call_operand.vmem [shape: f32[1,128], index: 2, kind: input, shape index: {}]   ;;  %s1590_s3 = inlined_call_operand.hbm [shape: f32[8,8,8,32], index: 3, kind: output, shape index: {}]  }
   0x1   :  { %10 = vsyncpa [#allocation3 + $0x1], 0 }
   0x2   :  { %11 = vsyncpa [#allocation4], 0 }
   0x3   :  { %13 = vsyncpa [#allocation4 + $0x1], 0  ;;  %s1066_s12 = smov 0   ;;  %s1068_s13 = smov 0  }
   0x4   :  { %s1070_s14 = smov 0   ;;  %s1072_s15 = smov 0  }
   0x5   :  { %s1074_s16 = smov 0   ;;  %s1076_s17 = smov 0  }
   0x6 LB: > { %s742_s18 = sadd.s32 4294967295, %s1031_s17   ;;  %s743_s19 = sadd.s32 4294967294, %s1031_s17   ;;  %s1031_s17 = sphi %s1076_s17, %s19_s17   ;;  %s1027_s16 = sphi %s1074_s16, %s1611_s16   ;;  %s1023_s15 = sphi %s1072_s15, %s1610_s15   ;;  %s1019_s14 = sphi %s1070_s14, %s1609_s14   ;;  %s1015_s13 = sphi %s1068_s13, %s1608_s13   ;;  %s1011_s12 = sphi %s1066_s12, %s1607_s12  }
   0x7   : > { %s34_s20 = sadd.s32 1, %s1027_s16  ;;  %s49_s21 = sadd.s32 1, %s1019_s14 }
   0x8   : > { %p36_p0 = scmp.ge.s32.totalorder %s34_s20, 8  ;;  %p56_p1 = scmp.ne.s32.totalorder %s1019_s14, %s1015_s13 }
   0x9   : > { %p57_p2 = scmp.eq.s32.totalorder %s1031_s17, 0  ;;  %p62_p3 = scmp.ne.s32.totalorder %s1015_s13, %s1011_s12 }
   0xa   : > { %s1613_s20 = smov (%p36_p0, %s34_s20), 0  ;;  %p63_p5 = scmp.eq.s32.totalorder %s742_s18, 0 }
   0xb   : > { %p1107_p4 = por %p57_p2, %p56_p1  ;;  %s43_s23 = ssub.s32 %s1027_s16, %s1613_s20 }
   0xc   : > { %p132_p6 = scmp.eq.s32.totalorder %s742_s18, 7  ;;  %p47_p7 = scmp.eq.s32.totalorder %s43_s23, 0 }
   0xd   : > { %p1113_p8 = por %p63_p5, %p62_p3  ;;  %p138_p10 = scmp.eq.s32.totalorder %s743_s19, 7 }
   0xe   : > { %p1117_p9 = por %p132_p6, %p56_p1  ;;  %p745_p12 = scmp.ge.s32.totalorder %s1031_s17, 8 }
   0xf   : > { %s1122_s26 = scalar_select %p47_p7, %s1019_s14, %s49_s21  }
  0x10   : > { %p1124_p11 = por %p138_p10, %p62_p3  ;;  %160 = sbr.rel (%p745_p12) target bundleno = 34 (0x22), region = 24 }
  0x15   : > { %s164_s28 = sand.u32 1, %s1019_s14   ;;  %s774_s29 = sshll.u32 %s1027_s16, 8 }
  0x16   : > { %s746_s30 = sshll.u32 %s164_s28, 7  ;;  %s178_s6 = scalar_lea.hbm %s1587_s0, %s774_s29 }
  0x17   : > { %s875_s7 = scalar_select %p1107_p4, [#allocation0], [#allocation8] }
  0x18   : > { %s168_s8 = scalar_lea.vmem [#allocation2], %s746_s30  ;;  %s1033_s11 = smov 2048  }
  0x19   : > { %s191_s9 = sshll.u32 %s168_s8, 4  ;;  %s183_s10 = sld [smem:[%s875_s7]]   ;;  %s192_s9 = int_to_ptr.vmem [resolvable:$true] %s191_s9 }
  0x1a   : > { %876 = sst [smem:[#allocation7]] (%p1107_p4), %s1033_s11  ;;  %s1034_s18 = smov 256  }
  0x1b   : > { %877 = sst [smem:[#allocation7 + $0x1]] (%p1107_p4), %s1034_s18  ;;  %s1035_s19 = smov 2  }
  0x1c   : > { %878 = sst [smem:[#allocation7 + $0x2]] (%p1107_p4), %s1035_s19  ;;  %s1036_s21 = smov 128  }
  0x1d   : > { %879 = sst [smem:[#allocation7 + $0x3]] (%p1107_p4), %s1036_s21  ;;  %s1037_s29 = smov 8  }
  0x1e   : > { %880 = sst [smem:[#allocation7 + $0x4]] (%p1107_p4), %s1036_s21  ;;  %s165_s4 = scalar_lea.sflag [#allocation3], %s164_s28 }
  0x1f   : > { %s749_s23 = sshll.u32 %s183_s10, 26  ;;  %881 = sst [smem:[#allocation7 + $0x5]] (%p1107_p4), %s1037_s29 }
  0x20   : > { %s750_s30 = sadd.s32 134217728, %s749_s23  ;;  %s1038_s5 = smov 131072  }
  0x21   : > { %882 = dma.general (%p1107_p4), %s178_s6, 2048, %s192_s9, %s165_s4, %s1038_s5, [#allocation7], %s750_s30, 0  }
  0x22 PF: > { %p751_p13 = scmp.ge.s32.totalorder %s1031_s17, 1  ;;  %p212_p0 = scmp.lt.s32.totalorder %s1031_s17, 9 }
  0x24   : > { %p213_p1 = pnand %p751_p13, %p212_p0 }
  0x25   : > { %s1153_s7 = sand.u32 (!%p213_p1), 1, %s1015_s13  }
  0x26   : > { %216 = sbr.rel (%p213_p1) target bundleno = 527 (0x20f), region = 32  ;;  %s752_s8 = sshll.u32 (!%p213_p1), %s1153_s7, 7 }
  0x27   : > { %s219_s10 = scalar_lea.sflag (!%p213_p1), [#allocation3], %s1153_s7  ;;  %s1157_s11 = scalar_lea.vmem (!%p213_p1), [#allocation2], %s752_s8 }
  0x2b   : > { %1002 = dma.done.wait (%p1113_p8), %s219_s10, 2048  }
  0x2c   : > { %1004 = vsyncadd (%p1113_p8), %s219_s10, 4294965248  ;;  %v1164_v0 = vld [vmem:[%s1157_s11] sm:$0xff]  ;;  %v1167_v1 = vld [vmem:[%s1157_s11 + $0x8] sm:$0xff]  ;;  %s1039_s22 = smov 127   ;;  %s1040_s8 = smov 64  }
  0x2d   : > { %265 = vrot.lane.b32.xlu0 %v1164_v0, %s1039_s22  ;;  %378 = vrot.lane.b32.xlu1 %v1167_v1, %s1039_s22  ;;  %v1174_v2 = vld [vmem:[%s1157_s11 + $0x40] sm:$0xff]  ;;  %v1177_v3 = vld [vmem:[%s1157_s11 + $0x48] sm:$0xff]  ;;  %v257_v27 = vand.u32 2147483647, %v1164_v0  ;;  %v370_v29 = vand.u32 2147483647, %v1167_v1 }
  0x2e   : > { %v1184_v4 = vld [vmem:[%s1157_s11 + $0x10] sm:$0xff]  ;;  %v1194_v6 = vld [vmem:[%s1157_s11 + $0x18] sm:$0xff]  ;;  %v1204_v8 = vld [vmem:[%s1157_s11 + $0x20] sm:$0xff]  ;;  %v261_v35 = vand.u32 2147483647, %v1174_v2  ;;  %s753_s9 = sshll.u32 %s1153_s7, 6 }
  0x2f   : > { %v1187_v5 = vld [vmem:[%s1157_s11 + $0x50] sm:$0xff]  ;;  %v1197_v7 = vld [vmem:[%s1157_s11 + $0x58] sm:$0xff]  ;;  %v1207_v9 = vld [vmem:[%s1157_s11 + $0x60] sm:$0xff]  ;;  %v374_v39 = vand.u32 2147483647, %v1177_v3  ;;  %s244_s18 = scalar_lea.vmem [#allocation5], %s753_s9 }
  0x30   : > { %v1214_v10 = vld [vmem:[%s1157_s11 + $0x28] sm:$0xff]  ;;  %v1224_v12 = vld [vmem:[%s1157_s11 + $0x30] sm:$0xff]  ;;  %v519_v14 = vld [vmem:[%s1588_s1 + $0x78] sm:$0xff]  ;;  %v258_v47 = vand.u32 2147483647, %v1184_v4  ;;  %s651_s19 = sshll.u32 %s244_s18, 4  ;;  %s1532_s19 = int_to_ptr.vmem [resolvable:$true] %s651_s19 }
  0x31   : > { %273 = vrot.lane.b32.xlu0 %v1174_v2, %s1039_s22  ;;  %386 = vrot.lane.b32.xlu1 %v1177_v3, %s1039_s22  ;;  %v1217_v11 = vld [vmem:[%s1157_s11 + $0x68] sm:$0xff]  ;;  %v1227_v13 = vld [vmem:[%s1157_s11 + $0x70] sm:$0xff]  ;;  %v262_v55 = vand.u32 2147483647, %v1187_v5  ;;  %v371_v58 = vand.u32 2147483647, %v1194_v6 }
  0x32   : > { %v518_v15 = vld [vmem:[%s1588_s1 + $0x70] sm:$0xff]  ;;  %v1240_v16 = vld [vmem:[%s1157_s11 + $0x38] sm:$0xff]  ;;  %799 = vmatprep.subr.mxu0 %v519_v14  ;;  %843 = vmatprep.subr.mxu1 %v519_v14  ;;  %v517_v18 = vld [vmem:[%s1588_s1 + $0x68] sm:$0xff]  ;;  %s771_s21 = sshll.u32 %s1023_s15, 7  ;;  %s635_s15 = scalar_lea.sflag [#allocation4], %s1153_s7 }
  0x33   : > { %v1243_v17 = vld [vmem:[%s1157_s11 + $0x78] sm:$0xff]  ;;  %800 = vmatpush3.msra.mxu0 %v519_v14  ;;  %859 = vmatpush3.msra.mxu1 %v519_v14  ;;  %v516_v19 = vld [vmem:[%s1588_s1 + $0x60] sm:$0xff]  ;;  %v514_v21 = vld [vmem:[%s1588_s1 + $0x50] sm:$0xff]  ;;  %s1538_s30 = scalar_lea.hbm %s1590_s3, %s771_s21  ;;  %s951_s4 = scalar_lea.vmem %s1532_s19, 1024 }
  0x34   : > { %801 = vmatprep.subr.mxu0 %v518_v15  ;;  %844 = vmatprep.subr.mxu1 %v518_v15  ;;  %v515_v20 = vld [vmem:[%s1588_s1 + $0x58] sm:$0xff]  ;;  %v513_v22 = vld [vmem:[%s1588_s1 + $0x48] sm:$0xff]  ;;  %v512_v23 = vld [vmem:[%s1588_s1 + $0x40] sm:$0xff]  ;;  %p952_p2 = scmp.ne.s32.totalorder %s1532_s19, %s951_s4  ;;  %s1042_s5 = smov [#allocation5]  }
  0x35   : > { %267 = vrot.lane.b32.xlu0 %v1184_v4, %s1039_s22  ;;  %275 = vrot.lane.b32.xlu1 %v1187_v5, %s1039_s22  ;;  %v511_v24 = vld [vmem:[%s1588_s1 + $0x38] sm:$0xff]  ;;  %v510_v25 = vld [vmem:[%s1588_s1 + $0x30] sm:$0xff] }
  0x36   : > { %802 = vmatpush3.msra.mxu0 %v518_v15  ;;  %860 = vmatpush3.msra.mxu1 %v518_v15  ;;  %v509_v26 = vld [vmem:[%s1588_s1 + $0x28] sm:$0xff]  ;;  %v508_v28 = vld [vmem:[%s1588_s1 + $0x20] sm:$0xff]  ;;  %v507_v34 = vld [vmem:[%s1588_s1 + $0x18] sm:$0xff]  ;;  %v259_v15 = vand.u32 2147483647, %v1204_v8  ;;  %p953_p3 = pnand %p952_p2, %p1117_p9 }
  0x37   : > { %803 = vmatprep.subr.mxu0 %v517_v18  ;;  %845 = vmatprep.subr.mxu1 %v517_v18  ;;  %v506_v38 = vld [vmem:[%s1588_s1 + $0x10] sm:$0xff]  ;;  %v505_v46 = vld [vmem:[%s1588_s1 + $0x8] sm:$0xff]  ;;  %v504_v50 = vld [vmem:[%s1588_s1] sm:$0xff] }
  0x38   : > { %804 = vmatpush3.msra.mxu0 %v517_v18  ;;  %861 = vmatpush3.msra.mxu1 %v517_v18  ;;  %p954_p4 = pneg %p953_p3 }
  0x39   : > { %380 = vrot.lane.b32.xlu0 %v1194_v6, %s1039_s22  ;;  %388 = vrot.lane.b32.xlu1 %v1197_v7, %s1039_s22 }
  0x3a   : > { %805 = vmatprep.subr.mxu0 %v516_v19  ;;  %846 = vmatprep.subr.mxu1 %v516_v19 }
  0x3b   : > { %806 = vmatpush3.msra.mxu0 %v516_v19  ;;  %862 = vmatpush3.msra.mxu1 %v516_v19 }
  0x3c   : > { %807 = vmatprep.subr.mxu0 %v515_v20  ;;  %847 = vmatprep.subr.mxu1 %v515_v20 }
  0x3d   : > { %269 = vrot.lane.b32.xlu0 %v1204_v8, %s1039_s22  ;;  %277 = vrot.lane.b32.xlu1 %v1207_v9, %s1039_s22 }
  0x3e   : > { %808 = vmatpush3.msra.mxu0 %v515_v20  ;;  %863 = vmatpush3.msra.mxu1 %v515_v20 }
  0x3f   : > { %809 = vmatprep.subr.mxu0 %v514_v21  ;;  %848 = vmatprep.subr.mxu1 %v514_v21 }
  0x40   : > { %810 = vmatpush3.msra.mxu0 %v514_v21  ;;  %864 = vmatpush3.msra.mxu1 %v514_v21 }
  0x41   : > { %382 = vrot.lane.b32.xlu0 %v1214_v10, %s1039_s22  ;;  %390 = vrot.lane.b32.xlu1 %v1217_v11, %s1039_s22 }
  0x42   : > { %811 = vmatprep.subr.mxu0 %v513_v22  ;;  %849 = vmatprep.subr.mxu1 %v513_v22 }
  0x43   : > { %812 = vmatpush3.msra.mxu0 %v513_v22  ;;  %865 = vmatpush3.msra.mxu1 %v513_v22  ;;  %v263_v22 = vand.u32 2147483647, %v1207_v9 }
  0x44   : > { %813 = vmatprep.subr.mxu0 %v512_v23  ;;  %850 = vmatprep.subr.mxu1 %v512_v23 }
  0x45   : > { %271 = vrot.lane.b32.xlu0 %v1224_v12, %s1039_s22  ;;  %279 = vrot.lane.b32.xlu1 %v1227_v13, %s1039_s22 }
  0x46   : > { %814 = vmatpush3.msra.mxu0 %v512_v23  ;;  %866 = vmatpush3.msra.mxu1 %v512_v23 }
  0x47   : > { %815 = vmatprep.subr.mxu0 %v511_v24  ;;  %851 = vmatprep.subr.mxu1 %v511_v24 }
  0x48   : > { %816 = vmatpush3.msra.mxu0 %v511_v24  ;;  %867 = vmatpush3.msra.mxu1 %v511_v24 }
  0x49   : > { %384 = vrot.lane.b32.xlu0 %v1240_v16, %s1039_s22  ;;  %392 = vrot.lane.b32.xlu1 %v1243_v17, %s1039_s22 }
  0x4a   : > { %817 = vmatprep.subr.mxu0 %v510_v25  ;;  %852 = vmatprep.subr.mxu1 %v510_v25 }
  0x4b   : > { %818 = vmatpush3.msra.mxu0 %v510_v25  ;;  %868 = vmatpush3.msra.mxu1 %v510_v25  ;;  %v372_v25 = vand.u32 2147483647, %v1214_v10 }
  0x4c   : > { %819 = vmatprep.subr.mxu0 %v509_v26  ;;  %853 = vmatprep.subr.mxu1 %v509_v26 }
  0x4d   : > { %820 = vmatpush3.msra.mxu0 %v509_v26  ;;  %869 = vmatpush3.msra.mxu1 %v509_v26 }
  0x4e   : > { %821 = vmatprep.subr.mxu0 %v508_v28  ;;  %854 = vmatprep.subr.mxu1 %v508_v28 }
  0x4f   : > { %822 = vmatpush3.msra.mxu0 %v508_v28  ;;  %870 = vmatpush3.msra.mxu1 %v508_v28 }
  0x50   : > { %823 = vmatprep.subr.mxu0 %v507_v34  ;;  %855 = vmatprep.subr.mxu1 %v507_v34 }
  0x51   : > { %824 = vmatpush3.msra.mxu0 %v507_v34  ;;  %871 = vmatpush3.msra.mxu1 %v507_v34 }
  0x52   : > { %825 = vmatprep.subr.mxu0 %v506_v38  ;;  %856 = vmatprep.subr.mxu1 %v506_v38 }
  0x53   : > { %826 = vmatpush3.msra.mxu0 %v506_v38  ;;  %872 = vmatpush3.msra.mxu1 %v506_v38 }
  0x54   : > { %827 = vmatprep.subr.mxu0 %v505_v46  ;;  %857 = vmatprep.subr.mxu1 %v505_v46 }
  0x55   : > { %828 = vmatpush3.msra.mxu0 %v505_v46  ;;  %873 = vmatpush3.msra.mxu1 %v505_v46 }
  0x56   : > { %829 = vmatprep.subr.mxu0 %v504_v50  ;;  %858 = vmatprep.subr.mxu1 %v504_v50 }
  0x57   : > { %830 = vmatpush3.msra.mxu0 %v504_v50  ;;  %874 = vmatpush3.msra.mxu1 %v504_v50 }
  0x9f   : > { %v266_v30 = vpop.permute.xlu0 %265  ;;  %v379_v31 = vpop.permute.xlu1 %378 }
  0xa0   : > { %v281_v32 = vand.u32 2147483647, %v266_v30  ;;  %v394_v33 = vand.u32 2147483647, %v379_v31 }
  0xa2   : > { %vm289_vm0 = vcmp.gt.f32.partialorder %v281_v32, %v257_v27  ;;  %v1285_v36 = vmax.f32 %v257_v27, %v281_v32  ;;  %v1287_v37 = vmax.f32 %v370_v29, %v394_v33  ;;  %vm1296_vm1 = vcmp.gt.f32.partialorder %v394_v33, %v370_v29 }
  0xa3   : > { %v274_v40 = vpop.permute.xlu0 %273  ;;  %v387_v41 = vpop.permute.xlu1 %386  ;;  %v1294_v42 = vsel %vm289_vm0, %v266_v30, %v1164_v0  ;;  %v1319_v54 = vsel %vm1296_vm1, %v379_v31, %v1167_v1  ;;  %v375_v1 = vand.u32 2147483647, %v1197_v7  ;;  %v376_v30 = vand.u32 2147483647, %v1217_v11 }
  0xa4   : > { %v285_v44 = vand.u32 2147483647, %v274_v40  ;;  %v398_v45 = vand.u32 2147483647, %v387_v41  ;;  %313 = vrot.lane.b32.xlu0 %v1294_v42, %s1040_s8  ;;  %v260_v33 = vand.u32 2147483647, %v1224_v12 }
  0xa6   : > { %vm293_vm2 = vcmp.gt.f32.partialorder %v285_v44, %v261_v35  ;;  %v1306_v48 = vmax.f32 %v261_v35, %v285_v44  ;;  %v1308_v49 = vmax.f32 %v374_v39, %v398_v45  ;;  %vm406_vm3 = vcmp.gt.f32.partialorder %v398_v45, %v374_v39 }
  0xa7   : > { %v268_v51 = vpop.permute.xlu0 %267  ;;  %v276_v52 = vpop.permute.xlu1 %275  ;;  %v1314_v53 = vsel %vm293_vm2, %v274_v40, %v1174_v2  ;;  %v1332_v63 = vsel %vm406_vm3, %v387_v41, %v1177_v3  ;;  %v264_v40 = vand.u32 2147483647, %v1227_v13  ;;  %v373_v44 = vand.u32 2147483647, %v1240_v16 }
  0xa8   : > { %v282_v56 = vand.u32 2147483647, %v268_v51  ;;  %v286_v57 = vand.u32 2147483647, %v276_v52  ;;  %321 = vrot.lane.b32.xlu1 %v1314_v53, %s1040_s8  ;;  %426 = vrot.lane.b32.xlu0 %v1319_v54, %s1040_s8 }
  0xaa   : > { %vm290_vm4 = vcmp.gt.f32.partialorder %v282_v56, %v258_v47  ;;  %v1327_v59 = vmax.f32 %v258_v47, %v282_v56  ;;  %v1329_v60 = vmax.f32 %v262_v55, %v286_v57  ;;  %vm294_vm5 = vcmp.gt.f32.partialorder %v286_v57, %v262_v55 }
  0xab   : > { %v381_v61 = vpop.permute.xlu0 %380  ;;  %v389_v62 = vpop.permute.xlu1 %388  ;;  %v1335_v0 = vsel %vm290_vm4, %v268_v51, %v1184_v4  ;;  %v1348_v20 = vsel %vm294_vm5, %v276_v52, %v1187_v5  ;;  %v377_v51 = vand.u32 2147483647, %v1243_v17 }
  0xac   : > { %v395_v2 = vand.u32 2147483647, %v381_v61  ;;  %v399_v14 = vand.u32 2147483647, %v389_v62  ;;  %434 = vrot.lane.b32.xlu1 %v1332_v63, %s1040_s8  ;;  %315 = vrot.lane.b32.xlu0 %v1335_v0, %s1040_s8 }
  0xae   : > { %vm403_vm6 = vcmp.gt.f32.partialorder %v395_v2, %v371_v58  ;;  %v1343_v3 = vmax.f32 %v371_v58, %v395_v2  ;;  %v1345_v4 = vmax.f32 %v375_v1, %v399_v14  ;;  %vm407_vm7 = vcmp.gt.f32.partialorder %v399_v14, %v375_v1 }
  0xaf   : > { %v270_v18 = vpop.permute.xlu0 %269  ;;  %v278_v19 = vpop.permute.xlu1 %277  ;;  %v1351_v21 = vsel %vm403_vm6, %v381_v61, %v1194_v6  ;;  %v1364_v28 = vsel %vm407_vm7, %v389_v62, %v1197_v7  ;;  %v491_v61 = vlaneseq  ;;  %v1041_v2 = vmov 0  }
  0xb0   : > { %v283_v23 = vand.u32 2147483647, %v270_v18  ;;  %v287_v24 = vand.u32 2147483647, %v278_v19  ;;  %323 = vrot.lane.b32.xlu1 %v1348_v20, %s1040_s8  ;;  %428 = vrot.lane.b32.xlu0 %v1351_v21, %s1040_s8 }
  0xb2   : > { %vm291_vm8 = vcmp.gt.f32.partialorder %v283_v23, %v259_v15  ;;  %v1359_v26 = vmax.f32 %v259_v15, %v283_v23  ;;  %v1361_v5 = vmax.f32 %v263_v22, %v287_v24  ;;  %vm295_vm9 = vcmp.gt.f32.partialorder %v287_v24, %v263_v22 }
  0xb3   : > { %v383_v6 = vpop.permute.xlu0 %382  ;;  %v391_v27 = vpop.permute.xlu1 %390  ;;  %v1367_v29 = vsel %vm291_vm8, %v270_v18, %v1204_v8  ;;  %v1380_v38 = vsel %vm295_vm9, %v278_v19, %v1207_v9 }
  0xb4   : > { %v396_v31 = vand.u32 2147483647, %v383_v6  ;;  %v400_v32 = vand.u32 2147483647, %v391_v27  ;;  %436 = vrot.lane.b32.xlu1 %v1364_v28, %s1040_s8  ;;  %317 = vrot.lane.b32.xlu0 %v1367_v29, %s1040_s8 }
  0xb6   : > { %vm404_vm10 = vcmp.gt.f32.partialorder %v396_v31, %v372_v25  ;;  %v1375_v34 = vmax.f32 %v372_v25, %v396_v31  ;;  %v1377_v7 = vmax.f32 %v376_v30, %v400_v32  ;;  %vm408_vm11 = vcmp.gt.f32.partialorder %v400_v32, %v376_v30 }
  0xb7   : > { %v272_v8 = vpop.permute.xlu0 %271  ;;  %v280_v35 = vpop.permute.xlu1 %279  ;;  %v1383_v39 = vsel %vm404_vm10, %v383_v6, %v1214_v10  ;;  %v1396_v47 = vsel %vm408_vm11, %v391_v27, %v1217_v11 }
  0xb8   : > { %v284_v41 = vand.u32 2147483647, %v272_v8  ;;  %v288_v43 = vand.u32 2147483647, %v280_v35  ;;  %325 = vrot.lane.b32.xlu1 %v1380_v38, %s1040_s8  ;;  %430 = vrot.lane.b32.xlu0 %v1383_v39, %s1040_s8 }
  0xba   : > { %vm292_vm12 = vcmp.gt.f32.partialorder %v284_v41, %v260_v33  ;;  %v1391_v45 = vmax.f32 %v260_v33, %v284_v41  ;;  %v1393_v9 = vmax.f32 %v264_v40, %v288_v43  ;;  %vm296_vm13 = vcmp.gt.f32.partialorder %v288_v43, %v264_v40 }
  0xbb   : > { %v385_v10 = vpop.permute.xlu0 %384  ;;  %v393_v46 = vpop.permute.xlu1 %392  ;;  %v1399_v50 = vsel %vm292_vm12, %v272_v8, %v1224_v12  ;;  %v1411_v11 = vsel %vm296_vm13, %v280_v35, %v1227_v13  ;;  %v247_v13 = vld [vmem:[%s1589_s2] sm:$0x1] }
  0xbc   : > { %v397_v52 = vand.u32 2147483647, %v385_v10  ;;  %v401_v55 = vand.u32 2147483647, %v393_v46  ;;  %438 = vrot.lane.b32.xlu1 %v1396_v47, %s1040_s8  ;;  %319 = vrot.lane.b32.xlu0 %v1399_v50, %s1040_s8  ;;  %vm248_vm0 = vcmp.gt.f32.partialorder %v247_v13, 0.5 }
  0xbd   : > { %v490_v14 = vsel %vm248_vm0, 1, %v1041_v2 }
  0xbe   : > { %vm405_vm14 = vcmp.gt.f32.partialorder %v397_v52, %v373_v44  ;;  %v1406_v56 = vmax.f32 %v373_v44, %v397_v52  ;;  %v1408_v57 = vmax.f32 %v377_v51, %v401_v55  ;;  %vm409_vm15 = vcmp.gt.f32.partialorder %v401_v55, %v377_v51 }
  0xbf   : > { %v1414_v12 = vsel %vm405_vm14, %v385_v10, %v1240_v16  ;;  %v1421_v58 = vsel %vm409_vm15, %v393_v46, %v1243_v17  ;;  %v492_v16 = vshrl.u32 %v491_v61, 7 }
  0xc0   : > { %327 = vrot.lane.b32.xlu1 %v1411_v11, %s1040_s8  ;;  %432 = vrot.lane.b32.xlu0 %v1414_v12, %s1040_s8 }
  0xc1   : > { %v493_v1 = vsub.s32 0, %v492_v16 }
  0xc3   : > { %v1428_v22 = vrot.slane %v490_v14, %v493_v1 }
  0xc4   : > { %440 = vrot.lane.b32.xlu1 %v1421_v58, %s1040_s8  ;;  %s955_s8 = sshll.u32 %s1042_s5, 4  ;;  %s956_s8 = int_to_ptr.vmem [resolvable:$false] %s955_s8 }
  0xc5   : > { %vm495_vm3 = vcmp.eq.s32.totalorder %v1428_v22, 1  ;;  %s957_s10 = scalar_lea.vmem %s956_s8, 2048  ;;  %p958_p5 = scmp.lt.s32.totalorder %s1532_s19, %s956_s8 }
  0xc6   : > { %p959_p6 = scmp.lt.s32.totalorder %s957_s10, %s951_s4 }
  0xc8   : > { %p960_p7 = por %p959_p6, %p958_p5 }
  0xca   : > { %p961_p8 = pnand %p960_p7, %p954_p4 }
 0x116   : > { %v314_v62 = vpop.permute.xlu0 %313 }
 0x117   : > { %v329_v15 = vand.u32 2147483647, %v314_v62 }
 0x119   : > { %vm337_vm1 = vcmp.gt.f32.partialorder %v329_v15, %v1285_v36  ;;  %v353_v24 = vmax.f32 %v1285_v36, %v329_v15 }
 0x11a   : > { %v322_v18 = vpop.permute.xlu1 %321  ;;  %v427_v19 = vpop.permute.xlu0 %426  ;;  %v345_v31 = vsel %vm337_vm1, %v314_v62, %v1294_v42 }
 0x11b   : > { %v442_v17 = vand.u32 2147483647, %v427_v19  ;;  %v333_v23 = vand.u32 2147483647, %v322_v18 }
 0x11d   : > { %vm450_vm2 = vcmp.gt.f32.partialorder %v442_v17, %v1287_v37  ;;  %v466_v25 = vmax.f32 %v1287_v37, %v442_v17  ;;  %vm1438_vm5 = vcmp.gt.f32.partialorder %v333_v23, %v1306_v48  ;;  %v357_v35 = vmax.f32 %v1306_v48, %v333_v23 }
 0x11e   : > { %v458_v6 = vsel %vm450_vm2, %v427_v19, %v1319_v54  ;;  %v435_v27 = vpop.permute.xlu1 %434  ;;  %v316_v30 = vpop.permute.xlu0 %315  ;;  %v349_v41 = vsel %vm1438_vm5, %v322_v18, %v1314_v53 }
 0x11f   : > { %v446_v32 = vand.u32 2147483647, %v435_v27  ;;  %vm474_vm4 = vcmp.gt.f32.partialorder %v466_v25, %v353_v24  ;;  %v330_v36 = vand.u32 2147483647, %v316_v30 }
 0x120   : > { %v482_v8 = vsel %vm474_vm4, %v458_v6, %v345_v31 }
 0x121   : > { %vm454_vm6 = vcmp.gt.f32.partialorder %v446_v32, %v1308_v49  ;;  %v470_v37 = vmax.f32 %v1308_v49, %v446_v32  ;;  %831 = vmatprep.mubr.msk.f32.mxu0 %vm495_vm3, %v482_v8  ;;  %vm1452_vm8 = vcmp.gt.f32.partialorder %v330_v36, %v1327_v59  ;;  %v354_v10 = vmax.f32 %v1327_v59, %v330_v36 }
 0x122   : > { %v462_v42 = vsel %vm454_vm6, %v435_v27, %v1332_v63  ;;  %v324_v54 = vpop.permute.xlu1 %323  ;;  %v429_v40 = vpop.permute.xlu0 %428  ;;  %v346_v52 = vsel %vm1452_vm8, %v316_v30, %v1335_v0 }
 0x123   : > { %v443_v43 = vand.u32 2147483647, %v429_v40  ;;  %vm478_vm7 = vcmp.gt.f32.partialorder %v470_v37, %v357_v35  ;;  %v334_v44 = vand.u32 2147483647, %v324_v54 }
 0x124   : > { %v486_v49 = vsel %vm478_vm7, %v462_v42, %v349_v41 }
 0x125   : > { %vm451_vm9 = vcmp.gt.f32.partialorder %v443_v43, %v1343_v3  ;;  %v467_v63 = vmax.f32 %v1343_v3, %v443_v43  ;;  %837 = vmatprep.mubr.msk.f32.mxu1 %vm495_vm3, %v486_v49  ;;  %vm1466_vm11 = vcmp.gt.f32.partialorder %v334_v44, %v1329_v60  ;;  %v358_v13 = vmax.f32 %v1329_v60, %v334_v44 }
 0x126   : > { %v459_v53 = vsel %vm451_vm9, %v429_v40, %v1351_v21  ;;  %v437_v46 = vpop.permute.xlu1 %436  ;;  %v318_v51 = vpop.permute.xlu0 %317  ;;  %v350_v1 = vsel %vm1466_vm11, %v324_v54, %v1348_v20  ;;  %vm625_vm11 = vcmask 261120  }
 0x127   : > { %v447_v55 = vand.u32 2147483647, %v437_v46  ;;  %vm475_vm10 = vcmp.gt.f32.partialorder %v467_v63, %v354_v10  ;;  %v331_v61 = vand.u32 2147483647, %v318_v51 }
 0x128   : > { %v483_v3 = vsel %vm475_vm10, %v459_v53, %v346_v52 }
 0x129   : > { %vm455_vm12 = vcmp.gt.f32.partialorder %v447_v55, %v1345_v4  ;;  %v471_v21 = vmax.f32 %v1345_v4, %v447_v55  ;;  %832 = vmatmul.mubr.msk.f32.vlgmr.msra.gmra.mxu0 %vm495_vm3, %v483_v3  ;;  %vm1480_vm14 = vcmp.gt.f32.partialorder %v331_v61, %v1359_v26  ;;  %v355_v15 = vmax.f32 %v1359_v26, %v331_v61 }
 0x12a   : > { %v463_v0 = vsel %vm455_vm12, %v437_v46, %v1364_v28  ;;  %v326_v16 = vpop.permute.xlu1 %325  ;;  %v431_v62 = vpop.permute.xlu0 %430  ;;  %v347_v17 = vsel %vm1480_vm14, %v318_v51, %v1367_v29 }
 0x12b   : > { %v444_v2 = vand.u32 2147483647, %v431_v62  ;;  %vm479_vm13 = vcmp.gt.f32.partialorder %v471_v21, %v358_v13  ;;  %v335_v14 = vand.u32 2147483647, %v326_v16 }
 0x12c   : > { %v487_v4 = vsel %vm479_vm13, %v463_v0, %v350_v1 }
 0x12d   : > { %vm452_vm15 = vcmp.gt.f32.partialorder %v444_v2, %v1375_v34  ;;  %v468_v28 = vmax.f32 %v1375_v34, %v444_v2  ;;  %838 = vmatmul.mubr.msk.f32.vlgmr.msra.gmra.mxu1 %vm495_vm3, %v487_v4  ;;  %vm1494_vm1 = vcmp.gt.f32.partialorder %v335_v14, %v1361_v5  ;;  %v359_v25 = vmax.f32 %v1361_v5, %v335_v14 }
 0x12e   : > { %v460_v20 = vsel %vm452_vm15, %v431_v62, %v1383_v39  ;;  %v439_v18 = vpop.permute.xlu1 %438  ;;  %v320_v19 = vpop.permute.xlu0 %319  ;;  %v351_v30 = vsel %vm1494_vm1, %v326_v16, %v1380_v38 }
 0x12f   : > { %v448_v23 = vand.u32 2147483647, %v439_v18  ;;  %vm476_vm0 = vcmp.gt.f32.partialorder %v468_v28, %v355_v15  ;;  %v332_v24 = vand.u32 2147483647, %v320_v19 }
 0x130   : > { %v484_v34 = vsel %vm476_vm0, %v460_v20, %v347_v17 }
 0x131   : > { %vm456_vm2 = vcmp.gt.f32.partialorder %v448_v23, %v1377_v7  ;;  %v472_v39 = vmax.f32 %v1377_v7, %v448_v23  ;;  %834 = vmatprep.mubr.msk.f32.mxu0 %vm495_vm3, %v484_v34  ;;  %vm340_vm5 = vcmp.gt.f32.partialorder %v332_v24, %v1391_v45  ;;  %v356_v33 = vmax.f32 %v1391_v45, %v332_v24 }
 0x132   : > { %v464_v29 = vsel %vm456_vm2, %v439_v18, %v1396_v47  ;;  %v328_v6 = vpop.permute.xlu1 %327  ;;  %v433_v27 = vpop.permute.xlu0 %432  ;;  %v348_v38 = vsel %vm340_vm5, %v320_v19, %v1399_v50 }
 0x133   : > { %v445_v31 = vand.u32 2147483647, %v433_v27  ;;  %vm480_vm4 = vcmp.gt.f32.partialorder %v472_v39, %v359_v25  ;;  %v336_v5 = vand.u32 2147483647, %v328_v6 }
 0x134   : > { %v488_v32 = vsel %vm480_vm4, %v464_v29, %v351_v30 }
 0x135   : > { %vm453_vm6 = vcmp.gt.f32.partialorder %v445_v31, %v1406_v56  ;;  %v469_v7 = vmax.f32 %v1406_v56, %v445_v31  ;;  %840 = vmatprep.mubr.msk.f32.mxu1 %vm495_vm3, %v488_v32  ;;  %vm344_vm8 = vcmp.gt.f32.partialorder %v336_v5, %v1393_v9  ;;  %v360_v45 = vmax.f32 %v1393_v9, %v336_v5 }
 0x136   : > { %v461_v47 = vsel %vm453_vm6, %v433_v27, %v1414_v12  ;;  %v441_v36 = vpop.permute.xlu1 %440  ;;  %v352_v37 = vsel %vm344_vm8, %v328_v6, %v1411_v11 }
 0x137   : > { %vm477_vm7 = vcmp.gt.f32.partialorder %v469_v7, %v356_v33  ;;  %v449_v8 = vand.u32 2147483647, %v441_v36 }
 0x138   : > { %v485_v35 = vsel %vm477_vm7, %v461_v47, %v348_v38 }
 0x139   : > { %vm457_vm9 = vcmp.gt.f32.partialorder %v449_v8, %v1408_v57  ;;  %v473_v56 = vmax.f32 %v1408_v57, %v449_v8  ;;  %835 = vmatmul.mubr.msk.f32.gmra.mxu0 %vm495_vm3, %v485_v35 }
 0x13a   : > { %v465_v12 = vsel %vm457_vm9, %v441_v36, %v1421_v58 }
 0x13b   : > { %vm481_vm10 = vcmp.gt.f32.partialorder %v473_v56, %v360_v45 }
 0x13c   : > { %v489_v50 = vsel %vm481_vm10, %v465_v12, %v352_v37 }
 0x13d   : > { %841 = vmatmul.mubr.msk.f32.gmra.mxu1 %vm495_vm3, %v489_v50 }
 0x1e9   : > { %v833_v9 = vpop.f32.mrf.mxu0 }
 0x1ea   : > { %627 = vst.msk [vmem:[%s244_s18 + $0x8] sm:$0xff] %vm625_vm11, %v833_v9 }
 0x1eb   : > { %v586_v57 = vpop.f32.mrf.mxu0 }
 0x1ec   : > { %626 = vst.msk [vmem:[%s244_s18] sm:$0xff] %vm625_vm11, %v586_v57 }
 0x1ed   : > { %v839_v42 = vpop.f32.mrf.mxu1 }
 0x1ee   : > { %631 = vst.msk [vmem:[%s244_s18 + $0x28] sm:$0xff] %vm625_vm11, %v839_v42 }
 0x1ef   : > { %v606_v11 = vpop.f32.mrf.mxu1 }
 0x1f0   : > { %630 = vst.msk [vmem:[%s244_s18 + $0x20] sm:$0xff] %vm625_vm11, %v606_v11 }
 0x1f9   : > { %v836_v58 = vpop.f32.mrf.mxu0 }
 0x1fa   : > { %629 = vst.msk [vmem:[%s244_s18 + $0x18] sm:$0xff] %vm625_vm11, %v836_v58 }
 0x1fb   : > { %v596_v22 = vpop.f32.mrf.mxu0 }
 0x1fc   : > { %628 = vst.msk [vmem:[%s244_s18 + $0x10] sm:$0xff] %vm625_vm11, %v596_v22 }
 0x1fd   : > { %v842_v54 = vpop.f32.mrf.mxu1 }
 0x1fe   : > { %633 = vst.msk [vmem:[%s244_s18 + $0x38] sm:$0xff] %vm625_vm11, %v842_v54 }
 0x1ff   : > { %v616_v40 = vpop.f32.mrf.mxu1 }
 0x200   : > { %632 = vst.msk [vmem:[%s244_s18 + $0x30] sm:$0xff] %vm625_vm11, %v616_v40 }
 0x201   : > { %964 = shalt.err (!%p961_p8)
}
 0x202   : > { %s965_s11 = scalar_lea.hbm %s1538_s30, 1024  ;;  %s969_s28 = scalar_lea.hbm %s1590_s3, 8192 }
 0x203   : > { %p966_p10 = scmp.ne.s32.totalorder %s1538_s30, %s965_s11  ;;  %p970_p0 = scmp.lt.s32.totalorder %s1538_s30, %s1590_s3 }
 0x204   : > { %p971_p1 = scmp.lt.s32.totalorder %s969_s28, %s965_s11 }
 0x205   : > { %p967_p12 = pnand %p966_p10, %p1117_p9 }
 0x206   : > { %p972_p2 = por %p971_p1, %p970_p0 }
 0x207   : > { %p968_p13 = pneg %p967_p12 }
 0x209   : > { %p973_p3 = pnand %p972_p2, %p968_p13 }
 0x20b   : > { %976 = shalt.err (!%p973_p3)
}
 0x20c   : > { %s1043_s18 = smov 128   ;;  %s1044_s21 = smov 1024  }
 0x20d   : > { %s1045_s23 = smov 8  }
 0x20e   : > { %884 = dma.vmem_to_hbm [thread:$0]  (%p1117_p9), %s1532_s19, 1024, %s1538_s30, %s635_s15, %s1043_s18, %s1044_s21, %s1045_s23  }
 0x20f PF: > { %p890_p4 = scmp.ge.s32.totalorder %s1031_s17, 2  ;;  %s666_s29 = sand.u32 1, %s1011_s12  }
 0x210   : > { %s667_s4 = scalar_lea.sflag [#allocation4], %s666_s29 }
 0x211   : > { %p887_p5 = pnand %p890_p4, %p1124_p11 }
 0x213   : > { %p888_p6 = pneg %p887_p5 }
 0x215   : > { %1006 = dma.done.wait (%p888_p6), %s667_s4, 1024  }
 0x216   : > { %1008 = vsyncadd (%p888_p6), %s667_s4, 4294966272  ;;  %s19_s17 = sadd.s32 1, %s1031_s17   ;;  %s1607_s12 = smov %s1015_s13 }
 0x217   : > { %p16_p7 = scmp.ge.s32.totalorder %s19_s17, 10   ;;  %s1608_s13 = smov %s1019_s14 }
 0x218   : > { %s1609_s14 = smov %s1122_s26  ;;  %s1610_s15 = smov %s1027_s16 }
 0x219   : > { %s1611_s16 = smov %s1613_s20  ;;  %18 = sbr.rel (!%p16_p7) target bundleno = 6 (0x6), region = 83 }
 0x21e   :  { %672 = vsyncpa [#allocation3], 1 }
 0x21f   :  { %674 = vsyncpa [#allocation3 + $0x1], 1 }
 0x220   :  { %675 = vsyncpa [#allocation4], 1 }
 0x221   :  { %677 = vsyncpa [#allocation4 + $0x1], 1 }

</bundles_post_ra>
